<compile_context>
chip_gen: v7x
topology: tpu7x:2x2x1
jax: 0.10.0
libtpu: 0.0.40
codegen_flags: <defaults>
</compile_context>

<pallas_src>
import math
import warnings

import jax
import jax.numpy as jnp
from jax.experimental import pallas as pl
from jax.experimental.pallas import tpu as pltpu


_ROW_TILE_MAX = 8192          # upper bound on rows per grid step (sweepable)
_TARGET_GRID_STEPS = 8        # aim for >=2 steps (pipelining) / 2 TCs on v7x
_MIN_ROW_TILE = 256           # don't shrink blocks below this (per-step overhead)
_MAX_BLOCK_BYTES = 4 << 20    # per-buffer VMEM budget (x2 for double buffering)
_MIN_PALLAS_ELEMS = 1 << 13   # below this, fused XLA wins (launch overhead)
_TWO_PI = 6.283185307179586

_HAS_STATEFUL_NORMAL = hasattr(pltpu, "stateful_normal")
# Which in-kernel noise implementation will compile on TPU.  The regimes
# differ (stateful_normal ~ HBM-write roofline; Box-Muller ~ EUP-bound), so
# make the chosen path visible instead of silently falling back.
NOISE_IMPL = "stateful_normal" if _HAS_STATEFUL_NORMAL else "box_muller_2x"
if not _HAS_STATEFUL_NORMAL:
    warnings.warn(
        "pltpu.stateful_normal unavailable; using the 2-output Box-Muller "
        "fallback (EUP-bound, slower than the HBM-write roofline).")


def _uniform_01(shape):
    """Uniform [0, 1) from the HW PRNG (mantissa trick, no int->float cvt)."""
    bits = pltpu.prng_random_bits(shape)                 # raw 32-bit draws
    mant = jnp.bitwise_and(bits, 0x007FFFFF)             # keep 23 mantissa bits
    fbits = jnp.bitwise_or(mant, 0x3F800000)             # exponent of 1.0 -> [1, 2)
    return pltpu.bitcast(fbits, jnp.float32) - 1.0


def _standard_normal_3d(groups, lane):
    """(groups, 8, lane) f32 standard normal from the seeded stateful HW PRNG."""
    shape = (groups, 8, lane)
    if _HAS_STATEFUL_NORMAL:
        return pltpu.stateful_normal(shape, jnp.float32)
    # Box-Muller fallback: use BOTH outputs per (u1, u2) pair -- halves the
    # log/sqrt EUP work and amortizes cos/sin over two outputs (perf review).
    half = (groups // 2, 8, lane)                        # groups is even
    u1 = _uniform_01(half)
    u2 = _uniform_01(half)
    r = jnp.sqrt(-2.0 * jnp.log(1.0 - u1))               # 1-u1 in (0, 1]
    t = _TWO_PI * u2
    z0 = r * jnp.cos(t)
    z1 = r * jnp.sin(t)
    return jnp.concatenate([z0, z1], axis=0)


def _normal_shared_prng_kernel(seed_ref, mean_ref, std_ref, out_ref):
    # Fold BOTH the call seed and the grid step into the PRNG seed so streams
    # from independent calls never alias (review: seed-overlap concern).
    # NOTE: noise therefore depends on the chosen row_tile / grid length.
    pltpu.prng_seed(seed_ref[0], pl.program_id(0))
    rt, lane = out_ref.shape                              # rt is a multiple of 16
    z = _standard_normal_3d(rt // 8, lane)                # (rt//8, 8, lane) f32
    # (8, lane) params broadcast against the leading dim: full-vreg operands,
    # no per-op sublane broadcast of a 1-row operand.
    y = mean_ref[...] + z * std_ref[...]
    out_ref[...] = y.reshape(rt, lane).astype(out_ref.dtype)


def _normal_shared_noise_kernel(mean_ref, std_ref, z_ref, out_ref):
    # Portable path: noise streamed in from HBM (used on CPU / interpret mode
    # where the TPU hardware PRNG primitives have no lowering).
    rt, lane = out_ref.shape
    z = z_ref[...].astype(jnp.float32).reshape(rt // 8, 8, lane)
    y = mean_ref[...] + z * std_ref[...]
    out_ref[...] = y.reshape(rt, lane).astype(out_ref.dtype)


def _choose_row_tile(rows, bytes_per_row):
    """Rows per grid step: VMEM-capped, >=2 (up to 8) grid steps when possible."""
    cap = max(16, (_MAX_BLOCK_BYTES // bytes_per_row) // 16 * 16)
    tile = min(rows, cap, _ROW_TILE_MAX)
    if rows >= 2 * _MIN_ROW_TILE:
        # >=2 steps hides the HBM writeback of block i-1 behind compute of
        # block i; >=2 also lets the "parallel" grid axis feed both v7x TCs.
        steps = min(_TARGET_GRID_STEPS, max(2, rows // _MIN_ROW_TILE))
        tile = min(tile, -(-rows // steps))
    return max(16, ((tile + 15) // 16) * 16)              # multiple of 16 sublanes


def _pallas_prng(seed, mean_lane, std_lane, rows, lane, row_tile, out_dtype):
    grid = (pl.cdiv(rows, row_tile),)
    return pl.pallas_call(
        _normal_shared_prng_kernel,
        out_shape=jax.ShapeDtypeStruct((rows, lane), out_dtype),
        grid_spec=pltpu.PrefetchScalarGridSpec(
            num_scalar_prefetch=1,                        # seed -> SMEM
            grid=grid,
            in_specs=[
                pl.BlockSpec((8, lane), lambda i, s: (0, 0)),   # mean (broadcast)
                pl.BlockSpec((8, lane), lambda i, s: (0, 0)),   # std  (broadcast)
            ],
            out_specs=pl.BlockSpec((row_tile, lane), lambda i, s: (i, 0)),
        ),
        compiler_params=pltpu.CompilerParams(
            dimension_semantics=("parallel",)),           # shardable across TCs
    )(jnp.asarray([seed], jnp.int32), mean_lane, std_lane)


def _pallas_noise(z, mean_lane, std_lane, rows, lane, row_tile, out_dtype):
    grid = (pl.cdiv(rows, row_tile),)
    return pl.pallas_call(
        _normal_shared_noise_kernel,
        out_shape=jax.ShapeDtypeStruct((rows, lane), out_dtype),
        grid_spec=pltpu.PrefetchScalarGridSpec(
            num_scalar_prefetch=0,
            grid=grid,
            in_specs=[
                pl.BlockSpec((8, lane), lambda i: (0, 0)),          # mean
                pl.BlockSpec((8, lane), lambda i: (0, 0)),          # std
                pl.BlockSpec((row_tile, lane), lambda i: (i, 0)),   # noise
            ],
            out_specs=pl.BlockSpec((row_tile, lane), lambda i: (i, 0)),
        ),
        compiler_params=pltpu.CompilerParams(
            dimension_semantics=("parallel",)),
    )(mean_lane, std_lane, z)


def normal_shared_forward(mean, logstd, b, n, *, seed=0, out_dtype=None):
    """out[b, n, d] = mean[d] + N(0,1) * exp(logstd[d]).  mean/logstd: (1,1,dim)."""
    dim = mean.shape[-1]
    if out_dtype is None:
        out_dtype = mean.dtype      # pass jnp.bfloat16 to halve written bytes (v5e)
    total = b * n * dim
    std = jnp.exp(logstd)           # hoisted out of the kernel (tiny (1,1,dim) op)

    # Lane-dense packing: fold `reps` consecutive dim-rows into one lane row of
    # width lane = lcm(dim, 128) so stores are full, unmasked 128-lane writes.
    reps = 128 // math.gcd(dim, 128)
    if (b * n) % reps == 0:
        lane = dim * reps
    else:
        reps, lane = 1, dim         # unpackable dim: masked lane stores, still in-kernel
    rows = total // lane

    if total < _MIN_PALLAS_ELEMS or rows < 8:
        # Tiny problems: kernel launch overhead dominates; let XLA fuse it.
        noise = jax.random.normal(jax.random.PRNGKey(seed), (b, n, dim), jnp.float32)
        return (mean + noise * std).astype(out_dtype)

    # Params tiled to (8, lane) f32: full (8,128)-vreg operands in the kernel.
    mean_lane = jnp.tile(mean.reshape(1, dim).astype(jnp.float32), (8, reps))
    std_lane = jnp.tile(std.reshape(1, dim).astype(jnp.float32), (8, reps))
    out_itemsize = jnp.dtype(out_dtype).itemsize

    out2d = None
    if jax.default_backend() == "tpu":
        # Write-only kernel: noise from the TPU HW PRNG, no HBM round-trip.
        row_tile = _choose_row_tile(rows, lane * out_itemsize)
        try:
            out2d = _pallas_prng(seed, mean_lane, std_lane, rows, lane,
                                 row_tile, out_dtype)
        except Exception:
            out2d = None   # e.g. forced interpret mode: HW PRNG has no lowering
    if out2d is None:
        # Portable path (CPU backend / interpret mode): noise streamed in.
        row_tile = _choose_row_tile(rows, lane * (4 + out_itemsize))
        z = jax.random.normal(jax.random.PRNGKey(seed), (rows, lane), jnp.float32)
        out2d = _pallas_noise(z, mean_lane, std_lane, rows, lane,
                              row_tile, out_dtype)
    return out2d.reshape(b, n, dim)


def init_params(key, num, dim, dtype=jnp.float32):
    # nn.init.xavier_uniform_ on a (1, 1, dim) tensor: fan_in = fan_out = dim.
    del num  # num does not affect the parameter shapes
    bound = math.sqrt(3.0 / dim)
    k_mean, k_logstd = jax.random.split(key)
    mean = jax.random.uniform(k_mean, (1, 1, dim), dtype, -bound, bound)
    logstd = jax.random.uniform(k_logstd, (1, 1, dim), dtype, -bound, bound)
    return mean, logstd


if __name__ == "__main__":
    key = jax.random.PRNGKey(0)
    k_params, k_mean2, k_logstd2 = jax.random.split(key, 3)

    num, dim = 8, 32
    mean, logstd = init_params(k_params, num=num, dim=dim)

    # 1) Module-default tiny call (b=2, num=8, dim=32): hits the size guard
    #    (fused-XLA path) -- launch overhead would dominate a kernel here.
    out_tiny = jax.block_until_ready(normal_shared_forward(mean, logstd, 2, num))
    assert out_tiny.shape == (2, num, dim)
    assert bool(jnp.all(jnp.isfinite(out_tiny)))

    # 2) Pallas-kernel path (forward(b, n) with n overriding num).
    b2, n2 = 4, 512
    mean2 = jax.random.normal(k_mean2, (1, 1, dim), jnp.float32)
    logstd2 = 0.5 * jax.random.normal(k_logstd2, (1, 1, dim), jnp.float32)

    out_a = normal_shared_forward(mean, logstd, b2, n2, seed=7)
    out_b = normal_shared_forward(mean2, logstd2, b2, n2, seed=7)
    out_a, out_b = jax.block_until_ready((out_a, out_b))
    assert out_a.shape == (b2, n2, dim)
    assert bool(jnp.all(jnp.isfinite(out_a))) and bool(jnp.all(jnp.isfinite(out_b)))

    # Recover the underlying standard-normal draw.  With the same seed it must
    # be identical across different (mean, logstd) pairs, which also validates
    # the lane-dense packing correspondence of the per-dim parameters.
    z_a = (out_a - mean) / jnp.exp(logstd)
    z_b = (out_b - mean2) / jnp.exp(logstd2)
    assert jnp.allclose(z_a, z_b, atol=1e-3)
    # The recovered noise is (approximately) standard normal.
    assert abs(float(z_a.mean())) < 0.05
    assert abs(float(z_a.std()) - 1.0) < 0.05

    # TODO(synk): noise matches pt.randn_like distributionally, not bit-for-bit
    # with torch's RNG (TPU hardware PRNG on device, jax.random elsewhere).
    print("KERNEL_OK")
</pallas_src>

<mosaic_0001>
module attributes {stable_mosaic.version = 11 : i64} {
  func.func @_normal_shared_noise_kernel(%arg0: i32, %arg1: memref<8x128xf32, #tpu.memory_space<vmem>>, %arg2: memref<8x128xf32, #tpu.memory_space<vmem>>, %arg3: memref<256x128xf32, #tpu.memory_space<vmem>>, %arg4: memref<256x128xf32, #tpu.memory_space<vmem>>) attributes {dimension_semantics = [#tpu.dimension_semantics<parallel>], iteration_bounds = array<i64: 2>, scalar_prefetch = 0 : i64, scratch_operands = 0 : i64, tpu.core_type = #tpu.core_type<tc>, window_params = [{pipeline_mode = #tpu.pipeline_mode<synchronous>, transform_indices = @transform_0, window_bounds = array<i64: 8, 128>}, {pipeline_mode = #tpu.pipeline_mode<synchronous>, transform_indices = @transform_1, window_bounds = array<i64: 8, 128>}, {transform_indices = @transform_2, window_bounds = array<i64: 256, 128>}, {transform_indices = @transform_3, window_bounds = array<i64: 256, 128>}]} {
    %c0 = arith.constant 0 : index
    %c0_0 = arith.constant 0 : index
    %0 = vector.load %arg3[%c0, %c0_0] : memref<256x128xf32, #tpu.memory_space<vmem>>, vector<256x128xf32>
    %1 = vector.shape_cast %0 : vector<256x128xf32> to vector<32x8x128xf32>
    %c0_1 = arith.constant 0 : index
    %c0_2 = arith.constant 0 : index
    %2 = vector.load %arg1[%c0_1, %c0_2] : memref<8x128xf32, #tpu.memory_space<vmem>>, vector<8x128xf32>
    %c0_3 = arith.constant 0 : index
    %c0_4 = arith.constant 0 : index
    %3 = vector.load %arg2[%c0_3, %c0_4] : memref<8x128xf32, #tpu.memory_space<vmem>>, vector<8x128xf32>
    %4 = vector.shape_cast %3 : vector<8x128xf32> to vector<1x8x128xf32>
    %5 = vector.broadcast %4 : vector<1x8x128xf32> to vector<32x8x128xf32>
    %6 = arith.mulf %1, %5 : vector<32x8x128xf32>
    %7 = vector.shape_cast %2 : vector<8x128xf32> to vector<1x8x128xf32>
    %8 = vector.broadcast %7 : vector<1x8x128xf32> to vector<32x8x128xf32>
    %9 = arith.addf %8, %6 : vector<32x8x128xf32>
    %10 = vector.shape_cast %9 : vector<32x8x128xf32> to vector<256x128xf32>
    %c0_5 = arith.constant 0 : index
    %c0_6 = arith.constant 0 : index
    %11 = vector.load %arg4[%c0_5, %c0_6] : memref<256x128xf32, #tpu.memory_space<vmem>>, vector<256x128xf32>
    tpu.vector_store %arg4[%c0_5, %c0_6], %10 {strides = array<i32>} : memref<256x128xf32, #tpu.memory_space<vmem>>, vector<256x128xf32>,
    return
  }
  func.func @transform_0(%arg0: i32) -> (i32, i32) {
    %c0_i32 = arith.constant 0 : i32
    %c0_i32_0 = arith.constant 0 : i32
    %c0_i32_1 = arith.constant 0 : i32
    return %c0_i32, %c0_i32_0 : i32, i32
  }
  func.func @transform_1(%arg0: i32) -> (i32, i32) {
    %c0_i32 = arith.constant 0 : i32
    %c0_i32_0 = arith.constant 0 : i32
    %c0_i32_1 = arith.constant 0 : i32
    return %c0_i32, %c0_i32_0 : i32, i32
  }
  func.func @transform_2(%arg0: i32) -> (i32, i32) {
    %c0_i32 = arith.constant 0 : i32
    %c0_i32_0 = arith.constant 0 : i32
    return %arg0, %c0_i32 : i32, i32
  }
  func.func @transform_3(%arg0: i32) -> (i32, i32) {
    %c0_i32 = arith.constant 0 : i32
    %c0_i32_0 = arith.constant 0 : i32
    return %arg0, %c0_i32 : i32, i32
  }
}

</mosaic_0001>

<bundles_post_ra>
// kernel: tpu_custom_call.1
= control target key start
LH: loop header
LB: loop body
LE: loop exit
PB: predicated region body
PF: predicated region fallthrough
CT: control target
= control target key end

     0   :  { %8 = vsyncpa [#allocation3], 0  ;;  %s1109_s0 = inlined_call_operand.hbm [shape: f32[8,128], index: 0, kind: input, shape index: {}]   ;;  %s1110_s1 = inlined_call_operand.hbm [shape: f32[8,128], index: 1, kind: input, shape index: {}]   ;;  %s1111_s2 = inlined_call_operand.hbm [shape: f32[512,128], index: 2, kind: input, shape index: {}]   ;;  %s1112_s3 = inlined_call_operand.hbm [shape: f32[512,128], index: 3, kind: output, shape index: {}]  }
   0x1   :  { %9 = vsyncpa [#allocation6], 0 }
   0x2   :  { %10 = vsyncpa [#allocation4], 0 }
   0x3   :  { %12 = vsyncpa [#allocation4 + $0x1], 0  ;;  %s731_s12 = smov 0   ;;  %s733_s13 = smov 0  }
   0x4   :  { %s735_s14 = smov 0   ;;  %s737_s15 = smov 0  }
   0x5 LB: > { %s752_s16 = sadd.s32 4294967295, %s701_s15   ;;  %s450_s17 = sadd.s32 4294967294, %s701_s15   ;;  %s701_s15 = sphi %s737_s15, %s1139_s15   ;;  %s697_s14 = sphi %s735_s14, %s1138_s14   ;;  %s693_s13 = sphi %s733_s13, %s1137_s13   ;;  %s689_s12 = sphi %s731_s12, %s1136_s12  }
   0x6   : > { %s756_s18 = sadd.s32 1, %s701_s15   ;;  %s67_s19 = sadd.s32 1, %s697_s14 }
   0x7   : > { %s64_s20 = ssub.s32 %s701_s15, %s756_s18  ;;  %p74_p0 = scmp.ne.s32.totalorder %s697_s14, %s693_s13 }
   0x8   : > { %p65_p1 = scmp.eq.s32.totalorder %s64_s20, 0  ;;  %p75_p2 = scmp.eq.s32.totalorder %s701_s15, 0 }
   0x9   : > { %p80_p3 = scmp.ne.s32.totalorder %s693_s13, %s689_s12  ;;  %p1113_p4 = scmp.eq.s32.totalorder %s752_s16, 0 }
   0xa   : > { %s768_s21 = scalar_select %p65_p1, %s697_s14, %s67_s19  }
   0xb   : > { %p770_p5 = por %p75_p2, %p74_p0  ;;  %p776_p6 = por %p1113_p4, %p80_p3 }
   0xc   : > { %p104_p7 = scmp.eq.s32.totalorder %s752_s16, 1  ;;  %p110_p8 = scmp.eq.s32.totalorder %s450_s17, 1 }
   0xd   : > { %s1119_s23 = scalar_select %p776_p6, 1, 0 }
   0xe   : > { %p451_p9 = scmp.ge.s32.totalorder %s701_s15, 1  ;;  %p117_p10 = scmp.lt.s32.totalorder %s701_s15, 3 }
   0xf   : > { %p783_p11 = por %p104_p7, %p74_p0  ;;  %p787_p12 = por %p110_p8, %p80_p3 }
  0x10   : > { %p791_p13 = pnand %p451_p9, %p117_p10  ;;  %s703_s27 = smov [#allocation2]  }
  0x11   : > { %s1120_s24 = scalar_select %p783_p11, 1, 0 }
  0x12   : > { %s1121_s25 = scalar_select %p787_p12, 1, 0 }
  0x13   : > { %s1122_s26 = scalar_select %p791_p13, 1, 0 }
  0x14   : > { %p482_p2 = pneg %p791_p13  ;;  %s130_s28 = sshll.u32 %s703_s27, 4  ;;  %s131_s28 = int_to_ptr.vmem [resolvable:$true] %s130_s28 }
  0x15   : > { %p499_p4 = scmp.lt.s32.totalorder %s701_s15, 2  ;;  %p1123_p0 = scmp.eq.s32.totalorder %s752_s16, 0 }
  0x16   : > { %s704_s4 = smov [#allocation5]   ;;  %s541_s8 = scalar_lea.hbm %s1109_s0, 128 }
  0x17   : > { %p801_p7 = pnand %p482_p2, %p1123_p0  ;;  %p807_p3 = pnand %p499_p4, %p770_p5 }
  0x18   : > { %s141_s5 = sshll.u32 %s704_s4, 4  ;;  %p542_p8 = scmp.ne.s32.totalorder %s1109_s0, %s541_s8  ;;  %s811_s5 = int_to_ptr.vmem [resolvable:$true] %s141_s5 }
  0x19   : > { %s1125_s30 = scalar_select %p807_p3, 1, 0 }
  0x1a   : > { %p543_p9 = pneg %p801_p7  ;;  %p548_p10 = scmp.lt.u32.totalorder %s541_s8, %s1109_s0 }
  0x1c   : > { %p544_p4 = pnand %p543_p9, %p542_p8 }
  0x1e   : > { %p545_p5 = pneg %p544_p4 }
  0x20   : > { %p550_p2 = pnand %p548_p10, %p545_p5 }
  0x22   : > { %553 = shalt.err (!%p550_p2)
}
  0x23   : > { %s554_s19 = scalar_lea.vmem %s131_s28, 128  ;;  %p562_p11 = scmp.lt.s32.totalorder %s131_s28, %s131_s28 }
  0x24   : > { %p555_p0 = scmp.ne.s32.totalorder %s131_s28, %s554_s19  ;;  %p563_p6 = scmp.lt.s32.totalorder %s554_s19, %s554_s19 }
  0x26   : > { %p557_p1 = pnand %p555_p0, %p543_p9  ;;  %p564_p13 = por %p563_p6, %p562_p11 }
  0x28   : > { %p558_p12 = pneg %p557_p1 }
  0x2a   : > { %p565_p3 = pnand %p564_p13, %p558_p12 }
  0x2c   : > { %568 = shalt.err (!%p565_p3)
}
  0x2d   : > { %485 = dma.hbm_to_vmem [thread:$0]  (!%p801_p7), %s1109_s0, 128, %s131_s28, [#allocation3]  }
  0x2e   : > { %s152_s27 = sand.u32 1, %s701_s15   ;;  %s569_s7 = scalar_lea.hbm %s1110_s1, 128 }
  0x2f   : > { %p570_p1 = scmp.ne.s32.totalorder %s1110_s1, %s569_s7  ;;  %p576_p12 = scmp.lt.u32.totalorder %s569_s7, %s1110_s1 }
  0x31   : > { %p572_p6 = pnand %p570_p1, %p543_p9 }
  0x33   : > { %p573_p11 = pneg %p572_p6 }
  0x35   : > { %p578_p13 = pnand %p576_p12, %p573_p11 }
  0x37   : > { %581 = shalt.err (!%p578_p13)
}
  0x38   : > { %s582_s28 = scalar_lea.vmem %s811_s5, 128  ;;  %p590_p5 = scmp.lt.s32.totalorder %s811_s5, %s811_s5 }
  0x39   : > { %p583_p3 = scmp.ne.s32.totalorder %s811_s5, %s582_s28  ;;  %p591_p10 = scmp.lt.s32.totalorder %s582_s28, %s582_s28 }
  0x3b   : > { %p585_p8 = pnand %p583_p3, %p543_p9  ;;  %p592_p2 = por %p591_p10, %p590_p5 }
  0x3d   : > { %p586_p4 = pneg %p585_p8 }
  0x3f   : > { %p593_p0 = pnand %p592_p2, %p586_p4 }
  0x41   : > { %596 = shalt.err (!%p593_p0)
}
  0x42   : > { %488 = dma.hbm_to_vmem [thread:$0]  (!%p801_p7), %s1110_s1, 128, %s811_s5, [#allocation6]  }
  0x43   : > { %s154_s20 = sand.u32 1, %s697_s14   ;;  %s468_s4 = sshll.u32 %s701_s15, 12 }
  0x44   : > { %s455_s22 = sshll.u32 %s154_s20, 8  ;;  %s866_s8 = scalar_lea.hbm %s1111_s2, %s468_s4 }
  0x45   : > { %s156_s29 = scalar_lea.vmem [#allocation7], %s455_s22  ;;  %s870_s10 = scalar_lea.sflag [#allocation3], %s152_s27 }
  0x46   : > { %s163_s9 = sshll.u32 %s156_s29, 4  ;;  %s597_s11 = scalar_lea.hbm %s866_s8, 4096  ;;  %s868_s9 = int_to_ptr.vmem [resolvable:$true] %s163_s9 }
  0x47   : > { %p598_p7 = scmp.ne.s32.totalorder %s866_s8, %s597_s11  ;;  %p1126_p9 = scmp.ne.s32.totalorder %s1125_s30, 0 }
  0x48   : > { %s602_s17 = scalar_lea.hbm %s1111_s2, 8192  ;;  %p603_p12 = scmp.lt.u32.totalorder %s866_s8, %s1111_s2 }
  0x49   : > { %p599_p1 = pneg %p1126_p9  ;;  %p604_p13 = scmp.lt.u32.totalorder %s602_s17, %s597_s11 }
  0x4a   : > { %p606_p8 = scmp.lt.u32.totalorder %s597_s11, %s866_s8 }
  0x4b   : > { %p600_p6 = pnand %p599_p1, %p598_p7  ;;  %p605_p3 = por %p604_p13, %p603_p12 }
  0x4d   : > { %p601_p11 = pneg %p600_p6  ;;  %p607_p4 = por %p606_p8, %p605_p3 }
  0x4f   : > { %p608_p5 = pnand %p607_p4, %p601_p11 }
  0x51   : > { %611 = shalt.err (!%p608_p5)
}
  0x52   : > { %s612_s27 = scalar_lea.vmem %s868_s9, 4096  ;;  %s705_s22 = smov [#allocation7]  }
  0x53   : > { %p613_p10 = scmp.ne.s32.totalorder %s868_s9, %s612_s27  ;;  %s617_s4 = sshll.u32 %s705_s22, 4  ;;  %s618_s4 = int_to_ptr.vmem [resolvable:$false] %s617_s4 }
  0x54   : > { %s619_s6 = scalar_lea.vmem %s618_s4, 8192  ;;  %p620_p7 = scmp.lt.s32.totalorder %s868_s9, %s618_s4 }
  0x55   : > { %p615_p2 = pnand %p613_p10, %p599_p1  ;;  %p621_p6 = scmp.lt.s32.totalorder %s619_s6, %s612_s27 }
  0x57   : > { %p616_p0 = pneg %p615_p2  ;;  %p622_p12 = por %p621_p6, %p620_p7 }
  0x59   : > { %p623_p13 = pnand %p622_p12, %p616_p0 }
  0x5b   : > { %626 = shalt.err (!%p623_p13)
}
  0x5c   : > { %s706_s7 = smov 128   ;;  %s707_s29 = smov 8  }
  0x5d   : > { %492 = dma.hbm_to_vmem [thread:$0]  (!%p1126_p9), %s866_s8, 4096, %s868_s9, %s870_s10, %s706_s7, %s706_s7, %s707_s29  }
  0x5e   : > { %p1127_p1 = scmp.ne.s32.totalorder %s1122_s26, 0 }
  0x5f   : > { %p1128_p11 = scmp.eq.s32.totalorder (!%p1127_p1), %s752_s16, 0 }
  0x60   : > { %175 = sbr.rel (%p1127_p1) target bundleno = 152 (0x98), region = 32 }
  0x67   : > { %672 = dma.done.wait (%p1128_p11), [#allocation3], 128   ;;  %p1129_p3 = pmov %p1128_p11 }
  0x69   : > { %674 = vsyncadd (%p1129_p3), [#allocation3], 4294967168  ;;  %p1130_p8 = pmov %p1129_p3 }
  0x6a   : > { %p1131_p4 = pmov %p1129_p3 }
  0x6b   : > { %676 = dma.done.wait (%p1130_p8), [#allocation6], 128  }
  0x6c   : > { %678 = vsyncadd (%p1131_p4), [#allocation6], 4294967168  ;;  %s185_s30 = sand.u32 1, %s752_s16   ;;  %s187_s8 = sand.u32 1, %s693_s13  }
  0x6d   : > { %s912_s26 = sshll.u32 %s187_s8, 8  ;;  %s186_s9 = scalar_lea.sflag [#allocation3], %s185_s30 }
  0x6e   : > { %s915_s10 = scalar_lea.vmem [#allocation7], %s912_s26  ;;  %p1132_p9 = scmp.ne.s32.totalorder %s1119_s23, 0 }
  0x70   : > { %680 = dma.done.wait (%p1132_p9), %s186_s9, 4096  }
  0x71   : > { %682 = vsyncadd (%p1132_p9), %s186_s9, 4294963200  ;;  %v214_v0 = vld [vmem:[%s915_s10] sm:$0xff]  ;;  %v922_v1 = vld [vmem:[#allocation2] sm:$0xff]  ;;  %s951_s23 = scalar_lea.vmem [#allocation8], %s912_s26  ;;  %s469_s11 = sshll.u32 %s752_s16, 12 }
  0x72   : > { %v924_v2 = vld [vmem:[#allocation5] sm:$0xff]  ;;  %v215_v4 = vld [vmem:[%s915_s10 + $0x8] sm:$0xff]  ;;  %v216_v5 = vld [vmem:[%s915_s10 + $0x10] sm:$0xff]  ;;  %s358_s5 = sshll.u32 %s951_s23, 4  ;;  %s1053_s17 = scalar_lea.hbm %s1112_s3, %s469_s11  ;;  %s1055_s5 = int_to_ptr.vmem [resolvable:$true] %s358_s5 }
  0x73   : > { %v248_v3 = vmul.f32 %v924_v2, %v214_v0  ;;  %v217_v6 = vld [vmem:[%s915_s10 + $0x18] sm:$0xff]  ;;  %v249_v7 = vmul.f32 %v924_v2, %v215_v4  ;;  %v250_v8 = vmul.f32 %v924_v2, %v216_v5  ;;  %v218_v10 = vld [vmem:[%s915_s10 + $0x20] sm:$0xff]  ;;  %v219_v11 = vld [vmem:[%s915_s10 + $0x28] sm:$0xff]  ;;  %s1067_s19 = scalar_lea.sflag [#allocation4], %s187_s8  ;;  %s627_s20 = scalar_lea.vmem %s1055_s5, 4096 }
  0x74   : > { %v251_v9 = vmul.f32 %v924_v2, %v217_v6  ;;  %v220_v12 = vld [vmem:[%s915_s10 + $0x30] sm:$0xff]  ;;  %v252_v14 = vmul.f32 %v924_v2, %v218_v10  ;;  %v253_v15 = vmul.f32 %v924_v2, %v219_v11  ;;  %v221_v17 = vld [vmem:[%s915_s10 + $0x38] sm:$0xff]  ;;  %v222_v18 = vld [vmem:[%s915_s10 + $0x40] sm:$0xff]  ;;  %p628_p5 = scmp.ne.s32.totalorder %s1055_s5, %s627_s20  ;;  %p1133_p10 = scmp.ne.s32.totalorder %s1120_s24, 0 }
  0x75   : > { %v280_v13 = vadd.f32 %v248_v3, %v922_v1  ;;  %v254_v16 = vmul.f32 %v924_v2, %v220_v12  ;;  %v223_v19 = vld [vmem:[%s915_s10 + $0x48] sm:$0xff]  ;;  %v281_v20 = vadd.f32 %v249_v7, %v922_v1  ;;  %v282_v21 = vadd.f32 %v250_v8, %v922_v1  ;;  %v224_v24 = vld [vmem:[%s915_s10 + $0x50] sm:$0xff]  ;;  %v225_v25 = vld [vmem:[%s915_s10 + $0x58] sm:$0xff]  ;;  %s708_s27 = smov [#allocation8]  }
  0x76   : > { %v283_v22 = vadd.f32 %v251_v9, %v922_v1  ;;  %v255_v23 = vmul.f32 %v924_v2, %v221_v17  ;;  %v226_v26 = vld [vmem:[%s915_s10 + $0x60] sm:$0xff]  ;;  %v284_v27 = vadd.f32 %v252_v14, %v922_v1  ;;  %v285_v28 = vadd.f32 %v253_v15, %v922_v1  ;;  %v227_v31 = vld [vmem:[%s915_s10 + $0x68] sm:$0xff]  ;;  %v228_v32 = vld [vmem:[%s915_s10 + $0x70] sm:$0xff]  ;;  %p629_p2 = pnand %p628_p5, %p1133_p10  ;;  %s631_s22 = sshll.u32 %s708_s27, 4  ;;  %s632_s22 = int_to_ptr.vmem [resolvable:$false] %s631_s22 }
  0x77   : > { %312 = vst [vmem:[%s951_s23] sm:$0xff] %v280_v13  ;;  %v286_v29 = vadd.f32 %v254_v16, %v922_v1  ;;  %v256_v30 = vmul.f32 %v924_v2, %v222_v18  ;;  %v229_v33 = vld [vmem:[%s915_s10 + $0x78] sm:$0xff]  ;;  %313 = vst [vmem:[%s951_s23 + $0x8] sm:$0xff] %v281_v20  ;;  %v257_v35 = vmul.f32 %v924_v2, %v223_v19  ;;  %v230_v38 = vld [vmem:[%s915_s10 + $0x80] sm:$0xff]  ;;  %s633_s4 = scalar_lea.vmem %s632_s22, 8192  ;;  %p634_p7 = scmp.lt.s32.totalorder %s1055_s5, %s632_s22 }
  0x78   : > { %314 = vst [vmem:[%s951_s23 + $0x10] sm:$0xff] %v282_v21  ;;  %315 = vst [vmem:[%s951_s23 + $0x18] sm:$0xff] %v283_v22  ;;  %v287_v34 = vadd.f32 %v255_v23, %v922_v1  ;;  %v258_v36 = vmul.f32 %v924_v2, %v224_v24  ;;  %v259_v37 = vmul.f32 %v924_v2, %v225_v25  ;;  %v231_v43 = vld [vmem:[%s915_s10 + $0x88] sm:$0xff]  ;;  %v232_v44 = vld [vmem:[%s915_s10 + $0x90] sm:$0xff]  ;;  %p630_p0 = pneg %p629_p2  ;;  %p635_p6 = scmp.lt.s32.totalorder %s633_s4, %s627_s20 }
  0x79   : > { %316 = vst [vmem:[%s951_s23 + $0x20] sm:$0xff] %v284_v27  ;;  %317 = vst [vmem:[%s951_s23 + $0x28] sm:$0xff] %v285_v28  ;;  %v288_v39 = vadd.f32 %v256_v30, %v922_v1  ;;  %v260_v40 = vmul.f32 %v924_v2, %v226_v26  ;;  %v261_v41 = vmul.f32 %v924_v2, %v227_v31  ;;  %v233_v45 = vld [vmem:[%s915_s10 + $0x98] sm:$0xff]  ;;  %v234_v50 = vld [vmem:[%s915_s10 + $0xa0] sm:$0xff] }
  0x7a   : > { %318 = vst [vmem:[%s951_s23 + $0x30] sm:$0xff] %v286_v29  ;;  %v262_v42 = vmul.f32 %v924_v2, %v228_v32  ;;  %319 = vst [vmem:[%s951_s23 + $0x38] sm:$0xff] %v287_v34  ;;  %v289_v46 = vadd.f32 %v257_v35, %v922_v1  ;;  %v290_v47 = vadd.f32 %v258_v36, %v922_v1  ;;  %v235_v51 = vld [vmem:[%s915_s10 + $0xa8] sm:$0xff]  ;;  %v236_v52 = vld [vmem:[%s915_s10 + $0xb0] sm:$0xff]  ;;  %p636_p12 = por %p635_p6, %p634_p7 }
  0x7b   : > { %v291_v48 = vadd.f32 %v259_v37, %v922_v1  ;;  %v263_v49 = vmul.f32 %v924_v2, %v229_v33  ;;  %320 = vst [vmem:[%s951_s23 + $0x40] sm:$0xff] %v288_v39  ;;  %v292_v53 = vadd.f32 %v260_v40, %v922_v1  ;;  %v293_v54 = vadd.f32 %v261_v41, %v922_v1  ;;  %v237_v57 = vld [vmem:[%s915_s10 + $0xb8] sm:$0xff]  ;;  %v238_v62 = vld [vmem:[%s915_s10 + $0xc0] sm:$0xff]  ;;  %v239_v5 = vld [vmem:[%s915_s10 + $0xc8] sm:$0xff] }
  0x7c   : > { %v294_v55 = vadd.f32 %v262_v42, %v922_v1  ;;  %v264_v56 = vmul.f32 %v924_v2, %v230_v38  ;;  %321 = vst [vmem:[%s951_s23 + $0x48] sm:$0xff] %v289_v46  ;;  %322 = vst [vmem:[%s951_s23 + $0x50] sm:$0xff] %v290_v47  ;;  %v265_v59 = vmul.f32 %v924_v2, %v231_v43  ;;  %v240_v6 = vld [vmem:[%s915_s10 + $0xd0] sm:$0xff]  ;;  %v241_v7 = vld [vmem:[%s915_s10 + $0xd8] sm:$0xff]  ;;  %p637_p13 = pnand %p636_p12, %p630_p0 }
  0x7d   : > { %323 = vst [vmem:[%s951_s23 + $0x58] sm:$0xff] %v291_v48  ;;  %v295_v58 = vadd.f32 %v263_v49, %v922_v1  ;;  %v266_v60 = vmul.f32 %v924_v2, %v232_v44  ;;  %v267_v61 = vmul.f32 %v924_v2, %v233_v45  ;;  %324 = vst [vmem:[%s951_s23 + $0x60] sm:$0xff] %v292_v53  ;;  %v242_v12 = vld [vmem:[%s915_s10 + $0xe0] sm:$0xff]  ;;  %v243_v13 = vld [vmem:[%s915_s10 + $0xe8] sm:$0xff] }
  0x7e   : > { %325 = vst [vmem:[%s951_s23 + $0x68] sm:$0xff] %v293_v54  ;;  %326 = vst [vmem:[%s951_s23 + $0x70] sm:$0xff] %v294_v55  ;;  %v296_v63 = vadd.f32 %v264_v56, %v922_v1  ;;  %v268_v0 = vmul.f32 %v924_v2, %v234_v50  ;;  %v269_v3 = vmul.f32 %v924_v2, %v235_v51  ;;  %v244_v14 = vld [vmem:[%s915_s10 + $0xf0] sm:$0xff]  ;;  %v245_v19 = vld [vmem:[%s915_s10 + $0xf8] sm:$0xff] }
  0x7f   : > { %v270_v4 = vmul.f32 %v924_v2, %v236_v52  ;;  %327 = vst [vmem:[%s951_s23 + $0x78] sm:$0xff] %v295_v58  ;;  %v297_v8 = vadd.f32 %v265_v59, %v922_v1  ;;  %v298_v9 = vadd.f32 %v266_v60, %v922_v1  ;;  %v299_v10 = vadd.f32 %v267_v61, %v922_v1 }
  0x80   : > { %v271_v11 = vmul.f32 %v924_v2, %v237_v57  ;;  %328 = vst [vmem:[%s951_s23 + $0x80] sm:$0xff] %v296_v63  ;;  %v300_v15 = vadd.f32 %v268_v0, %v922_v1  ;;  %v301_v16 = vadd.f32 %v269_v3, %v922_v1  ;;  %v272_v18 = vmul.f32 %v924_v2, %v238_v62 }
  0x81   : > { %v302_v17 = vadd.f32 %v270_v4, %v922_v1  ;;  %329 = vst [vmem:[%s951_s23 + $0x88] sm:$0xff] %v297_v8  ;;  %330 = vst [vmem:[%s951_s23 + $0x90] sm:$0xff] %v298_v9  ;;  %v273_v21 = vmul.f32 %v924_v2, %v239_v5  ;;  %v274_v22 = vmul.f32 %v924_v2, %v240_v6 }
  0x82   : > { %331 = vst [vmem:[%s951_s23 + $0x98] sm:$0xff] %v299_v10  ;;  %v303_v20 = vadd.f32 %v271_v11, %v922_v1  ;;  %v275_v23 = vmul.f32 %v924_v2, %v241_v7  ;;  %332 = vst [vmem:[%s951_s23 + $0xa0] sm:$0xff] %v300_v15  ;;  %v304_v24 = vadd.f32 %v272_v18, %v922_v1 }
  0x83   : > { %333 = vst [vmem:[%s951_s23 + $0xa8] sm:$0xff] %v301_v16  ;;  %334 = vst [vmem:[%s951_s23 + $0xb0] sm:$0xff] %v302_v17  ;;  %v276_v25 = vmul.f32 %v924_v2, %v242_v12  ;;  %v277_v26 = vmul.f32 %v924_v2, %v243_v13  ;;  %v278_v27 = vmul.f32 %v924_v2, %v244_v14 }
  0x84   : > { %335 = vst [vmem:[%s951_s23 + $0xb8] sm:$0xff] %v303_v20  ;;  %v305_v28 = vadd.f32 %v273_v21, %v922_v1  ;;  %v306_v29 = vadd.f32 %v274_v22, %v922_v1  ;;  %v307_v30 = vadd.f32 %v275_v23, %v922_v1  ;;  %v279_v31 = vmul.f32 %v924_v2, %v245_v19 }
  0x85   : > { %336 = vst [vmem:[%s951_s23 + $0xc0] sm:$0xff] %v304_v24  ;;  %v308_v32 = vadd.f32 %v276_v25, %v922_v1  ;;  %v309_v33 = vadd.f32 %v277_v26, %v922_v1  ;;  %v310_v34 = vadd.f32 %v278_v27, %v922_v1 }
  0x86   : > { %337 = vst [vmem:[%s951_s23 + $0xc8] sm:$0xff] %v305_v28  ;;  %338 = vst [vmem:[%s951_s23 + $0xd0] sm:$0xff] %v306_v29  ;;  %v311_v2 = vadd.f32 %v279_v31, %v922_v1 }
  0x87   : > { %339 = vst [vmem:[%s951_s23 + $0xd8] sm:$0xff] %v307_v30  ;;  %340 = vst [vmem:[%s951_s23 + $0xe0] sm:$0xff] %v308_v32 }
  0x88   : > { %341 = vst [vmem:[%s951_s23 + $0xe8] sm:$0xff] %v309_v33  ;;  %342 = vst [vmem:[%s951_s23 + $0xf0] sm:$0xff] %v310_v34 }
  0x89   : > { %343 = vst [vmem:[%s951_s23 + $0xf8] sm:$0xff] %v311_v2 }
  0x8a   : > { %640 = shalt.err (!%p637_p13)
}
  0x8b   : > { %s641_s6 = scalar_lea.hbm %s1053_s17, 4096  ;;  %s645_s30 = scalar_lea.hbm %s1112_s3, 8192 }
  0x8c   : > { %p642_p1 = scmp.ne.s32.totalorder %s1053_s17, %s641_s6  ;;  %p646_p8 = scmp.lt.u32.totalorder %s1053_s17, %s1112_s3 }
  0x8d   : > { %p647_p4 = scmp.lt.u32.totalorder %s645_s30, %s641_s6  ;;  %p649_p5 = scmp.lt.u32.totalorder %s641_s6, %s1053_s17 }
  0x8e   : > { %p643_p11 = pnand %p642_p1, %p1133_p10 }
  0x8f   : > { %p648_p9 = por %p647_p4, %p646_p8 }
  0x90   : > { %p644_p3 = pneg %p643_p11 }
  0x91   : > { %p650_p2 = por %p649_p5, %p648_p9 }
  0x93   : > { %p651_p0 = pnand %p650_p2, %p644_p3 }
  0x95   : > { %654 = shalt.err (!%p651_p0)
}
  0x96   : > { %s709_s9 = smov 128   ;;  %s710_s10 = smov 8  }
  0x97   : > { %480 = dma.vmem_to_hbm [thread:$0]  (%p1133_p10), %s1055_s5, 4096, %s1053_s17, %s1067_s19, %s709_s9, %s709_s9, %s710_s10  }
  0x98 PF: > { %s373_s23 = sand.u32 1, %s689_s12   ;;  %p1134_p7 = scmp.ne.s32.totalorder %s1121_s25, 0 }
  0x99   : > { %p1135_p6 = scmp.ge.s32.totalorder %s701_s15, 2  ;;  %s374_s11 = scalar_lea.sflag [#allocation4], %s373_s23 }
  0x9b   : > { %p494_p12 = pnand %p1135_p6, %p1134_p7 }
  0x9d   : > { %684 = dma.done.wait (!%p494_p12), %s374_s11, 4096  }
  0x9e   : > { %686 = vsyncadd (!%p494_p12), %s374_s11, 4294963200  ;;  %p15_p13 = scmp.ge.s32.totalorder %s756_s18, 4   ;;  %s1136_s12 = smov %s693_s13 }
  0x9f   : > { %s1137_s13 = smov %s697_s14  ;;  %s1138_s14 = smov %s768_s21 }
  0xa0   : > { %s1139_s15 = smov %s756_s18  ;;  %17 = sbr.rel (!%p15_p13) target bundleno = 5 (0x5), region = 84 }
  0xa7   :  { %379 = vsyncpa [#allocation3], 1 }
  0xa8   :  { %381 = vsyncpa [#allocation3 + $0x1], 1 }
  0xa9   :  { %382 = vsyncpa [#allocation6], 1 }
  0xaa   :  { %383 = vsyncpa [#allocation4], 1 }
  0xab   :  { %385 = vsyncpa [#allocation4 + $0x1], 1 }

</bundles_post_ra>
